<compile_context>
chip_gen: v7x
topology: tpu7x:2x2x1
jax: 0.10.0
libtpu: 0.0.40
codegen_flags: <defaults>
</compile_context>

<pallas_src>
import math
from functools import partial

import jax
import jax.numpy as jnp
from jax.experimental import pallas as pl
from jax.experimental.pallas import tpu as pltpu


# ---------------------------------------------------------------------------
# Kernels
# ---------------------------------------------------------------------------


def _sphere_dirs_kernel_fast(sin_phi_ref, cos_phi_ref, sin_t0_ref, cos_t0_ref,
                             lane_tab_ref, dirs_ref):
    """Fast path: W % 128 == 0 and chunk start 128-aligned.

    Each 128-lane row of rays lies inside one image row h, so sin/cos(phi) and
    sin/cos(theta at lane 0) are per-row values (precomputed by the wrapper and
    streamed in as (rt, 1) columns).  Full-width sin/cos(theta) is rebuilt with
    angle addition against the constant (2, 128) sin/cos(lane*dtheta) table:
        sin(t0 + d) = sin(t0)*cos(d) + cos(t0)*sin(d)
        cos(t0 + d) = cos(t0)*cos(d) - sin(t0)*sin(d)
    -> zero EUP transcendentals and zero integer div/mod inside the kernel;
    it is pure vld + VPU FMA + full-width unmasked vst.
    """
    rt = dirs_ref.shape[1]
    sin_phi = sin_phi_ref[...]          # (rt, 1)
    cos_phi = cos_phi_ref[...]          # (rt, 1)
    sin_t0 = sin_t0_ref[...]            # (rt, 1)
    cos_t0 = cos_t0_ref[...]            # (rt, 1)
    sin_dl = lane_tab_ref[0:1, :]       # (1, 128) = sin(lane * dtheta)
    cos_dl = lane_tab_ref[1:2, :]       # (1, 128) = cos(lane * dtheta)

    sin_t = sin_t0 * cos_dl + cos_t0 * sin_dl   # (rt, 128)
    cos_t = cos_t0 * cos_dl - sin_t0 * sin_dl   # (rt, 128)

    odt = dirs_ref.dtype
    dirs_ref[0, :, :] = (cos_t * sin_phi).astype(odt)
    dirs_ref[1, :, :] = (sin_t * sin_phi).astype(odt)
    dirs_ref[2, :, :] = jnp.broadcast_to(cos_phi, (rt, 128)).astype(odt)


def _sphere_dirs_kernel_general(start_ref, dirs_ref, *, image_width, image_height):
    """General fallback: arbitrary W / unaligned chunk start.

    Produces ray directions for an (rt, 128) lane-dense tile of flat ray
    indices r = h*W + w (matching the reference transpose(1,0,2).reshape(-1,3)
    ordering).  start is a runtime SMEM scalar so chunk_idx changes do not
    trigger recompilation.
    """
    W = image_width
    H = image_height
    rt = dirs_ref.shape[1]
    dtheta = (2.0 * math.pi) / (W - 1) if W > 1 else 0.0
    dphi = math.pi / (H - 1) if H > 1 else 0.0

    # Scalar part of the index math folded into a single scalar (review item 4).
    base = start_ref[0] + pl.program_id(0) * (rt * 128)

    row = jax.lax.broadcasted_iota(jnp.int32, (rt, 128), 0)
    lane = jax.lax.broadcasted_iota(jnp.int32, (rt, 128), 1)
    r = base + (row * 128 + lane)        # global flat ray index = h*W + w

    if (W & (W - 1)) == 0:
        # Power-of-two W (includes W == 1): shift/mask.
        shift = max(W.bit_length() - 1, 0)
        h = r >> shift
        w = r & (W - 1)
    else:
        # Non-power-of-two W: float-reciprocal floor divide + one-step
        # correction (review item 5) instead of the long i32 vdiv sequence.
        # Exact after correction for any h < 2^23 (always true here).
        inv_w = jnp.float32(1.0 / W)
        h = jnp.floor(r.astype(jnp.float32) * inv_w).astype(jnp.int32)
        w_est = r - h * W
        h = jnp.where(w_est >= W, h + 1, h)
        h = jnp.where(w_est < 0, h - 1, h)
        w = r - h * W

    theta = w.astype(jnp.float32) * jnp.float32(dtheta)
    phi = h.astype(jnp.float32) * jnp.float32(dphi)

    # Padding rays (r >= W*H) give phi > pi; values stay finite and the padded
    # rows/lanes are dropped as OOB block rows or sliced off in the wrapper.
    sin_phi = jnp.sin(phi)
    odt = dirs_ref.dtype
    dirs_ref[0, :, :] = (jnp.cos(theta) * sin_phi).astype(odt)
    dirs_ref[1, :, :] = (jnp.sin(theta) * sin_phi).astype(odt)
    dirs_ref[2, :, :] = jnp.cos(phi).astype(odt)


# ---------------------------------------------------------------------------
# Wrapper
# ---------------------------------------------------------------------------


@partial(jax.jit, static_argnames=("chunk", "packed"))
def _unpack_directions(dirs_packed, chunk, packed):
    """(3, n_rows, 128) kernel output -> final layout, in ONE fused XLA pass."""
    three, n_rows, lanes = dirs_packed.shape
    flat = dirs_packed.reshape(three, n_rows * lanes)[:, :chunk]
    if packed:
        return flat[None]            # (1, 3, chunk): lane-dense, no transpose
    return flat.T[None]              # (1, chunk, 3): module's original layout


def sphere_raysampler_forward(camera_center, *, n_pts_per_ray, min_depth,
                              max_depth, image_width, image_height,
                              chunksize=None, chunk_idx=0, rows_per_block=1024,
                              directions_dtype=jnp.float32,
                              packed_directions=False,
                              materialize_constant_fields=True,
                              core_parallel=False):
    """Pallas implementation of SphereRaysampler.forward.

    camera_center: (1, 3) float32 — stand-in for cameras.get_camera_center().

    Returns a dict mimicking RayBundle(origins, directions, lengths, xys):
      origins (1, chunk, 3), directions (1, chunk, 3) [(1, 3, chunk) if
      packed_directions], lengths (1, chunk, n_pts_per_ray), xys (1, chunk, 2).

    Perf flags (from the review):
      materialize_constant_fields=False: origins/lengths/xys are returned as
        broadcastable (1, 1, ...) arrays — skips the O(chunk*n_pts) HBM write.
      packed_directions=True: return the kernel's lane-dense layout, no
        transpose pass.
      directions_dtype=jnp.bfloat16: halve direction store/HBM bytes (v5e).
      core_parallel=True: mark the grid axis CORE_PARALLEL (v7x 2-TC sharding).
    """
    W, H = int(image_width), int(image_height)
    total_rays = W * H
    assert 0 < total_rays < 2**31, "flat int32 ray index would overflow"
    if chunksize is None:
        chunksize = total_rays
    start = chunksize * chunk_idx
    assert 0 <= start < 2**31, "chunk start would overflow int32"
    stop = min(chunksize * (chunk_idx + 1), total_rays)
    chunk = max(stop - start, 0)

    # Constant RayBundle fields (identical for every ray): plain XLA
    # broadcasts (or un-materialized), never kernel work.
    origins_1 = camera_center.reshape(1, 1, 3).astype(jnp.float32)
    depths = jnp.linspace(min_depth, max_depth, n_pts_per_ray, dtype=jnp.float32)
    lengths_1 = depths[None, None]                          # (1, 1, n_pts)
    xys_1 = jnp.array([[[0.5, 0.5]]], dtype=jnp.float32)    # (1, 1, 2)

    if chunk == 0:  # chunk_idx past the end of the image
        directions = (jnp.zeros((1, 3, 0), directions_dtype) if packed_directions
                      else jnp.zeros((1, 0, 3), directions_dtype))
        if materialize_constant_fields:
            return {"origins": jnp.zeros((1, 0, 3), jnp.float32),
                    "directions": directions,
                    "lengths": jnp.zeros((1, 0, n_pts_per_ray), jnp.float32),
                    "xys": jnp.zeros((1, 0, 2), jnp.float32)}
        return {"origins": origins_1, "directions": directions,
                "lengths": lengths_1, "xys": xys_1}

    # Lane-dense packing: chunk rays -> n_rows rows of 128 lanes.
    n_rows = pl.cdiv(chunk, 128)
    sub = 16 if directions_dtype in (jnp.bfloat16, jnp.float16) else 8
    rpb = max(sub, (int(rows_per_block) // sub) * sub)
    rt = n_rows if n_rows <= rpb else rpb
    grid = (pl.cdiv(n_rows, rt),)

    dim_sem = (pltpu.CORE_PARALLEL,) if core_parallel else ("parallel",)
    cparams = pltpu.CompilerParams(dimension_semantics=dim_sem)
    out_shape = jax.ShapeDtypeStruct((3, n_rows, 128), directions_dtype)
    out_spec = pl.BlockSpec((3, rt, 128), lambda i: (0, i, 0))

    dtheta = (2.0 * math.pi) / (W - 1) if W > 1 else 0.0
    dphi = math.pi / (H - 1) if H > 1 else 0.0

    fast = (W % 128 == 0) and (start % 128 == 0)
    if fast:
        # Per-row quantities: only chunk/128 transcendental elements, computed
        # by XLA here and streamed to the kernel as tiny (n_rows, 1) columns.
        row0 = start + 128 * jnp.arange(n_rows, dtype=jnp.int32)  # lane-0 flat idx
        h = row0 // W
        w0 = row0 - h * W
        phi = h.astype(jnp.float32) * jnp.float32(dphi)
        theta0 = w0.astype(jnp.float32) * jnp.float32(dtheta)
        sin_phi_rows = jnp.sin(phi)[:, None]
        cos_phi_rows = jnp.cos(phi)[:, None]
        sin_t0_rows = jnp.sin(theta0)[:, None]
        cos_t0_rows = jnp.cos(theta0)[:, None]
        lane_ang = jnp.arange(128, dtype=jnp.float32) * jnp.float32(dtheta)
        lane_tab = jnp.stack([jnp.sin(lane_ang), jnp.cos(lane_ang)], axis=0)

        col_spec = pl.BlockSpec((rt, 1), lambda i: (i, 0))
        dirs_packed = pl.pallas_call(
            _sphere_dirs_kernel_fast,
            grid=grid,
            in_specs=[col_spec, col_spec, col_spec, col_spec,
                      pl.BlockSpec((2, 128), lambda i: (0, 0))],
            out_specs=out_spec,
            out_shape=out_shape,
            compiler_params=cparams,
        )(sin_phi_rows, cos_phi_rows, sin_t0_rows, cos_t0_rows, lane_tab)
    else:
        # Runtime scalar in SMEM: chunk_idx changes do not recompile.
        start_arr = jnp.asarray([start], dtype=jnp.int32)
        kernel = partial(_sphere_dirs_kernel_general,
                         image_width=W, image_height=H)
        dirs_packed = pl.pallas_call(
            kernel,
            grid=grid,
            in_specs=[pl.BlockSpec(memory_space=pltpu.MemorySpace.SMEM)],
            out_specs=out_spec,
            out_shape=out_shape,
            compiler_params=cparams,
        )(start_arr)

    directions = _unpack_directions(dirs_packed, chunk, packed_directions)

    if materialize_constant_fields:
        origins = jnp.broadcast_to(origins_1, (1, chunk, 3))
        lengths = jnp.broadcast_to(lengths_1, (1, chunk, n_pts_per_ray))
        xys = jnp.broadcast_to(xys_1, (1, chunk, 2))
    else:
        origins, lengths, xys = origins_1, lengths_1, xys_1

    return {"origins": origins, "directions": directions,
            "lengths": lengths, "xys": xys}


# ---------------------------------------------------------------------------
# Pure-JAX reference (mirrors the PyTorch/numpy forward)
# ---------------------------------------------------------------------------


def _reference(camera_center, *, n_pts_per_ray, min_depth, max_depth,
               image_width, image_height, chunksize, chunk_idx):
    W, H = image_width, image_height
    theta = jnp.linspace(0.0, 2.0 * jnp.pi, W)
    phi = jnp.linspace(0.0, jnp.pi, H)
    x = jnp.outer(jnp.cos(theta), jnp.sin(phi))[..., None]
    y = jnp.outer(jnp.sin(theta), jnp.sin(phi))[..., None]
    z = jnp.outer(jnp.ones_like(theta), jnp.cos(phi))[..., None]
    dirs = jnp.concatenate((x, y, z), axis=-1)
    dirs = jnp.transpose(dirs, (1, 0, 2)).reshape(-1, 3)[None]
    dirs = dirs[:, chunksize * chunk_idx: chunksize * (chunk_idx + 1)]
    chunk = dirs.shape[1]
    origins = jnp.broadcast_to(camera_center[None], (1, chunk, 3))
    depths = jnp.linspace(min_depth, max_depth, n_pts_per_ray)
    lengths = jnp.broadcast_to(depths[None, None], (1, chunk, n_pts_per_ray))
    xys = jnp.broadcast_to(jnp.array([0.5, 0.5])[None, None], (1, chunk, 2))
    return {"origins": origins, "directions": dirs, "lengths": lengths,
            "xys": xys}


if __name__ == "__main__":
    # n_pts_per_ray=64 matches the hard-coded `.expand(1, real_chunk_size, 64)`.
    n_pts_per_ray = 64
    min_depth, max_depth = 0.5, 2.0
    key = jax.random.PRNGKey(0)
    camera_center = jax.random.normal(key, (1, 3), dtype=jnp.float32)

    # (W, H, chunksize, chunk_idx, rows_per_block, directions_dtype, tol, label)
    cases = [
        (16, 16, None, 0, 1024, jnp.float32, 1e-3, "general, pow2 W, full image"),
        (16, 16, 100, 1, 1024, jnp.float32, 1e-3, "general, unaligned chunk offset"),
        (24, 10, None, 0, 1024, jnp.float32, 1e-3, "general, non-pow2 W (reciprocal div)"),
        (16, 265, None, 0, 8, jnp.float32, 1e-3, "general, multi-block + partial last block"),
        (128, 8, None, 0, 1024, jnp.float32, 1e-3, "fast, single block"),
        (128, 12, 512, 1, 1024, jnp.float32, 1e-3, "fast, 128-aligned chunk offset"),
        (128, 20, None, 0, 8, jnp.float32, 1e-3, "fast, partial last grid block"),
        (384, 6, None, 0, 8, jnp.float32, 1e-3, "fast, non-pow2 W multiple of 128"),
        (128, 16, None, 0, 1024, jnp.bfloat16, 1e-2, "fast, bf16 directions (v5e opt)"),
        (16, 16, 256, 10, 1024, jnp.float32, 1e-3, "empty chunk (chunk_idx past end)"),
    ]

    for (W, H, chunksize, chunk_idx, rpb, ddtype, tol, label) in cases:
        out = sphere_raysampler_forward(
            camera_center, n_pts_per_ray=n_pts_per_ray, min_depth=min_depth,
            max_depth=max_depth, image_width=W, image_height=H,
            chunksize=chunksize, chunk_idx=chunk_idx, rows_per_block=rpb,
            directions_dtype=ddtype)
        jax.block_until_ready(out)

        cs = chunksize if chunksize is not None else W * H
        ref = _reference(
            camera_center, n_pts_per_ray=n_pts_per_ray, min_depth=min_depth,
            max_depth=max_depth, image_width=W, image_height=H,
            chunksize=cs, chunk_idx=chunk_idx)
        for name in ("origins", "directions", "lengths", "xys"):
            assert out[name].shape == ref[name].shape, (
                label, name, out[name].shape, ref[name].shape)
            if out[name].size:
                err = float(jnp.max(jnp.abs(
                    out[name].astype(jnp.float32) - ref[name])))
                assert err < tol, (label, name, err)

    # Perf-path flags from the review: lane-dense packed directions + lazy
    # (non-materialized) constant fields.
    Wp, Hp = 128, 8
    out_p = sphere_raysampler_forward(
        camera_center, n_pts_per_ray=n_pts_per_ray, min_depth=min_depth,
        max_depth=max_depth, image_width=Wp, image_height=Hp,
        packed_directions=True, materialize_constant_fields=False)
    jax.block_until_ready(out_p)
    ref_p = _reference(
        camera_center, n_pts_per_ray=n_pts_per_ray, min_depth=min_depth,
        max_depth=max_depth, image_width=Wp, image_height=Hp,
        chunksize=Wp * Hp, chunk_idx=0)
    assert out_p["directions"].shape == (1, 3, Wp * Hp)
    err = float(jnp.max(jnp.abs(
        jnp.swapaxes(out_p["directions"], 1, 2) - ref_p["directions"])))
    assert err < 1e-3, err
    assert out_p["lengths"].shape == (1, 1, n_pts_per_ray)
    err = float(jnp.max(jnp.abs(
        jnp.broadcast_to(out_p["lengths"], ref_p["lengths"].shape)
        - ref_p["lengths"])))
    assert err < 1e-6, err

    print("KERNEL_OK")
</pallas_src>

<mosaic_0001>
module attributes {stable_mosaic.version = 11 : i64} {
  func.func @_sphere_dirs_kernel_general(%arg0: i32, %arg1: memref<1xi32, #tpu.memory_space<smem>>, %arg2: memref<3x2x128xf32, #tpu.memory_space<vmem>>) attributes {dimension_semantics = [#tpu.dimension_semantics<parallel>], iteration_bounds = array<i64: 1>, scalar_prefetch = 0 : i64, scratch_operands = 0 : i64, tpu.core_type = #tpu.core_type<tc>, window_params = [{transform_indices = @transform_0, window_bounds = array<i64: 1>}, {transform_indices = @transform_1, window_bounds = array<i64: 3, 2, 128>}]} {
    %c0 = arith.constant 0 : index
    %0 = memref.load %arg1[%c0] : memref<1xi32, #tpu.memory_space<smem>>
    %c256_i32 = arith.constant 256 : i32
    %1 = arith.muli %arg0, %c256_i32 : i32
    %2 = arith.addi %0, %1 : i32
    %3 = tpu.iota {dimensions = array<i32: 0>} : vector<2x128xi32>
    %4 = tpu.iota {dimensions = array<i32: 1>} : vector<2x128xi32>
    %c128_i32 = arith.constant 128 : i32
    %5 = vector.broadcast %c128_i32 : i32 to vector<2x128xi32>
    %6 = arith.muli %3, %5 : vector<2x128xi32>
    %7 = arith.addi %6, %4 : vector<2x128xi32>
    %8 = vector.broadcast %2 : i32 to vector<2x128xi32>
    %9 = arith.addi %8, %7 : vector<2x128xi32>
    %c4_i32 = arith.constant 4 : i32
    %10 = vector.broadcast %c4_i32 : i32 to vector<2x128xi32>
    %11 = arith.shrsi %9, %10 : vector<2x128xi32>
    %c15_i32 = arith.constant 15 : i32
    %12 = vector.broadcast %c15_i32 : i32 to vector<2x128xi32>
    %13 = arith.andi %9, %12 : vector<2x128xi32>
    %14 = arith.sitofp %13 : vector<2x128xi32> to vector<2x128xf32>
    %cst = arith.constant 0.418879032 : f32
    %15 = vector.broadcast %cst : f32 to vector<2x128xf32>
    %16 = arith.mulf %14, %15 : vector<2x128xf32>
    %17 = arith.sitofp %11 : vector<2x128xi32> to vector<2x128xf32>
    %cst_0 = arith.constant 0.209439516 : f32
    %18 = vector.broadcast %cst_0 : f32 to vector<2x128xf32>
    %19 = arith.mulf %17, %18 : vector<2x128xf32>
    %20 = math.sin %19 : vector<2x128xf32>
    %21 = math.cos %16 : vector<2x128xf32>
    %22 = arith.mulf %21, %20 : vector<2x128xf32>
    %c0_1 = arith.constant 0 : index
    %c0_2 = arith.constant 0 : index
    %c0_3 = arith.constant 0 : index
    %23 = vector.load %arg2[%c0_1, %c0_2, %c0_3] : memref<3x2x128xf32, #tpu.memory_space<vmem>>, vector<1x2x128xf32>
    %24 = vector.shape_cast %23 : vector<1x2x128xf32> to vector<2x128xf32>
    %25 = vector.shape_cast %22 : vector<2x128xf32> to vector<1x2x128xf32>
    tpu.vector_store %arg2[%c0_1, %c0_2, %c0_3], %25 {strides = array<i32>} : memref<3x2x128xf32, #tpu.memory_space<vmem>>, vector<1x2x128xf32>,
    %26 = math.sin %16 : vector<2x128xf32>
    %27 = arith.mulf %26, %20 : vector<2x128xf32>
    %c1 = arith.constant 1 : index
    %c0_4 = arith.constant 0 : index
    %c0_5 = arith.constant 0 : index
    %28 = vector.load %arg2[%c1, %c0_4, %c0_5] : memref<3x2x128xf32, #tpu.memory_space<vmem>>, vector<1x2x128xf32>
    %29 = vector.shape_cast %28 : vector<1x2x128xf32> to vector<2x128xf32>
    %30 = vector.shape_cast %27 : vector<2x128xf32> to vector<1x2x128xf32>
    tpu.vector_store %arg2[%c1, %c0_4, %c0_5], %30 {strides = array<i32>} : memref<3x2x128xf32, #tpu.memory_space<vmem>>, vector<1x2x128xf32>,
    %31 = math.cos %19 : vector<2x128xf32>
    %c2 = arith.constant 2 : index
    %c0_6 = arith.constant 0 : index
    %c0_7 = arith.constant 0 : index
    %32 = vector.load %arg2[%c2, %c0_6, %c0_7] : memref<3x2x128xf32, #tpu.memory_space<vmem>>, vector<1x2x128xf32>
    %33 = vector.shape_cast %32 : vector<1x2x128xf32> to vector<2x128xf32>
    %34 = vector.shape_cast %31 : vector<2x128xf32> to vector<1x2x128xf32>
    tpu.vector_store %arg2[%c2, %c0_6, %c0_7], %34 {strides = array<i32>} : memref<3x2x128xf32, #tpu.memory_space<vmem>>, vector<1x2x128xf32>,
    return
  }
  func.func @transform_0(%arg0: i32) -> i32 {
    %c0_i32 = arith.constant 0 : i32
    %c0_i32_0 = arith.constant 0 : i32
    return %c0_i32 : i32
  }
  func.func @transform_1(%arg0: i32) -> (i32, i32, i32) {
    %c0_i32 = arith.constant 0 : i32
    %c0_i32_0 = arith.constant 0 : i32
    %c0_i32_1 = arith.constant 0 : i32
    return %c0_i32, %arg0, %c0_i32_0 : i32, i32, i32
  }
}

</mosaic_0001>

<bundles_post_ra>
// kernel: tpu_custom_call.1
= control target key start
LH: loop header
LB: loop body
LE: loop exit
PB: predicated region body
PF: predicated region fallthrough
CT: control target
= control target key end

     0   :  { %v13_v0 = vlaneseq  ;;  %s637_s0 = inlined_call_operand.<no memory space> [shape: s32[1], index: 0, kind: input, shape index: {}]   ;;  %s638_s1 = inlined_call_operand.hbm [shape: f32[3,2,128], index: 1, kind: output, shape index: {}]  }
   0x1   :  { %7 = vsyncpa [#allocation4], 0  ;;  %v19_v4 = vstv %s637_s0  ;;  %v529_v35 = vmov 683565275   ;;  %v530_v37 = vmov 2475754826  }
   0x2   :  { %v14_v1 = vshrl.u32 %v13_v0, 7  ;;  %v16_v2 = vand.u32 127, %v13_v0  ;;  %v531_v39 = vmov 2131351028   ;;  %v532_v41 = vmov 2102212464  }
   0x3   :  { %v533_v43 = vmov 920167782   ;;  %v534_v51 = vmov 1326507024   ;;  %s535_s0 = smov [#allocation3]  }
   0x4   :  { %v17_v3 = vmul.u32 128, %v14_v1  ;;  %s453_s8 = sshll.u32 %s535_s0, 4  ;;  %s454_s8 = int_to_ptr.vmem [resolvable:$true] %s453_s8 }
   0x5   :  { %s505_s9 = scalar_lea.vmem %s454_s8, 96  ;;  %p510_p1 = scmp.lt.s32.totalorder %s454_s8, %s454_s8 }
   0x6   :  { %v18_v5 = vadd.s32 %v17_v3, %v16_v2  ;;  %p506_p0 = scmp.ne.s32.totalorder %s454_s8, %s505_s9  ;;  %p511_p2 = scmp.lt.s32.totalorder %s505_s9, %s505_s9 }
   0x8   :  { %v20_v6 = vadd.s32 %v19_v4, %v18_v5  ;;  %p512_p3 = por %p511_p2, %p510_p1 }
   0xa   :  { %v21_v7 = vshra.s32 %v20_v6, 4  ;;  %v22_v8 = vand.u32 15, %v20_v6  ;;  %p513_p4 = pnand %p512_p3, %p506_p0 }
   0xc   :  { %v23_v9 = vcvt.s32.f32 %v22_v8  ;;  %v25_v10 = vcvt.s32.f32 %v21_v7 }
   0xe   :  { %v551_v11 = vmul.f32 0.41887903, %v23_v9  ;;  %v553_v12 = vmul.f32 0.20943952, %v25_v10 }
  0x10   :  { %v27_v13 = vand.u32 2147483647, %v553_v12  ;;  %v30_v14 = vand.u32 2139095040, %v553_v12  ;;  %v131_v15 = vand.u32 2147483647, %v551_v11  ;;  %v134_v16 = vand.u32 2139095040, %v551_v11 }
  0x11   :  { %vm29_vm14 = vcmp.lt.s32.totalorder %v553_v12, 0 }
  0x12   :  { %v31_v17 = vshrl.u32 %v30_v14, 23  ;;  %v34_v18 = vand.u32 8388607, %v27_v13  ;;  %v135_v19 = vshrl.u32 %v134_v16, 23  ;;  %v138_v20 = vand.u32 8388607, %v131_v15 }
  0x13   :  { %vm28_vm15 = vcmp.le.f32.partialorder %v27_v13, 0.7853982 }
  0x14   :  { %v464_v21 = vadd.s32 4294967169, %v31_v17  ;;  %v468_v22 = vadd.s32 4294967169, %v135_v19  ;;  %v35_v24 = vor.u32 8388608, %v34_v18  ;;  %v139_v25 = vor.u32 8388608, %v138_v20 }
  0x16   :  { %v37_v23 = vadd.s32 1, %v464_v21  ;;  %v141_v26 = vadd.s32 1, %v468_v22  ;;  %v563_v31 = vshll.u32 %v35_v24, 8  ;;  %v565_v33 = vshll.u32 %v139_v25, 8 }
  0x18   :  { %vm38_vm0 = vcmp.gt.s32.totalorder %v37_v23, 0  ;;  %vm142_vm1 = vcmp.gt.s32.totalorder %v141_v26, 0 }
  0x19   :  { %v39_v27 = vsel %vm38_vm0, %v37_v23, 0  ;;  %v143_v30 = vsel %vm142_vm1, %v141_v26, 0  ;;  %vm133_vm0 = vcmp.lt.s32.totalorder %v551_v11, 0  ;;  %vm132_vm1 = vcmp.le.f32.partialorder %v131_v15, 0.7853982 }
  0x1a   :  { %v40_v28 = vshrl.u32 %v39_v27, 5  ;;  %v41_v29 = vand.u32 31, %v39_v27  ;;  %v145_v32 = vand.u32 31, %v143_v30  ;;  %v567_v45 = vshrl.u32 %v143_v30, 5 }
  0x1c   :  { %v42_v34 = vsub.s32 32, %v41_v29  ;;  %v44_v36 = vshll.u32 %v529_v35, %v41_v29  ;;  %v47_v38 = vshll.u32 %v530_v37, %v41_v29  ;;  %v50_v40 = vshll.u32 %v531_v39, %v41_v29 }
  0x1d   :  { %v53_v42 = vshll.u32 %v532_v41, %v41_v29  ;;  %v56_v44 = vshll.u32 %v533_v43, %v41_v29  ;;  %vm59_vm2 = vcmp.lt.s32.totalorder %v40_v28, 1  ;;  %vm60_vm3 = vcmp.lt.s32.totalorder %v40_v28, 2 }
  0x1e   :  { %v43_v46 = vshrl.u32 %v529_v35, %v42_v34  ;;  %v45_v47 = vshrl.u32 %v530_v37, %v42_v34  ;;  %v48_v48 = vshrl.u32 %v531_v39, %v42_v34  ;;  %v51_v49 = vshrl.u32 %v532_v41, %v42_v34 }
  0x1f   :  { %v54_v50 = vshrl.u32 %v533_v43, %v42_v34  ;;  %v57_v52 = vshrl.u32 %v534_v51, %v42_v34  ;;  %vm62_vm4 = vcmp.lt.s32.totalorder %v40_v28, 4  ;;  %v146_v56 = vsub.s32 32, %v145_v32 }
  0x20   :  { %v46_v53 = vor.u32 %v45_v47, %v44_v36  ;;  %v49_v54 = vor.u32 %v48_v48, %v47_v38  ;;  %v52_v55 = vor.u32 %v51_v49, %v50_v40  ;;  %vm61_vm5 = vcmp.lt.s32.totalorder %v40_v28, 3 }
  0x21   :  { %v55_v57 = vor.u32 %v54_v50, %v53_v42  ;;  %v58_v58 = vor.u32 %v57_v52, %v56_v44  ;;  %v148_v59 = vshll.u32 %v529_v35, %v145_v32  ;;  %v151_v3 = vshll.u32 %v530_v37, %v145_v32 }
  0x22   :  { %v63_v60 = vsel %vm59_vm2, %v43_v46, %v46_v53  ;;  %v64_v61 = vsel %vm62_vm4, %v52_v55, 2102212464  ;;  %v67_v62 = vsel %vm59_vm2, %v46_v53, %v49_v54  ;;  %v71_v63 = vsel %vm59_vm2, %v49_v54, %v52_v55 }
  0x23   :  { %v65_v0 = vsel %vm61_vm5, %v49_v54, %v64_v61  ;;  %v68_v1 = vsel %vm62_vm4, %v55_v57, 920167782  ;;  %v72_v2 = vsel %vm62_vm4, %v58_v58, 1326507024  ;;  %v147_v6 = vshrl.u32 %v529_v35, %v146_v56 }
  0x24   :  { %v69_v4 = vsel %vm61_vm5, %v52_v55, %v68_v1  ;;  %v73_v5 = vsel %vm61_vm5, %v55_v57, %v72_v2  ;;  %v149_v7 = vshrl.u32 %v530_v37, %v146_v56  ;;  %v66_v8 = vsel %vm60_vm3, %v63_v60, %v65_v0 }
  0x25   :  { %v70_v9 = vsel %vm60_vm3, %v67_v62, %v69_v4  ;;  %v74_v10 = vsel %vm60_vm3, %v71_v63, %v73_v5  ;;  %v152_v14 = vshrl.u32 %v531_v39, %v146_v56  ;;  %v154_v22 = vshll.u32 %v531_v39, %v145_v32 }
  0x26   :  { %v576_v16 = vmul.u32.u64.low %v563_v31, %v74_v10  ;;  %v577_v17 = vmul.u32.u64.high %v563_v31, %v74_v10, %v576_v16  ;;  %v580_v18 = vmul.u32.u64.low %v563_v31, %v70_v9  ;;  %v581_v19 = vmul.u32.u64.high %v563_v31, %v70_v9, %v580_v18 }
  0x27   :  { %v150_v20 = vor.u32 %v149_v7, %v148_v59  ;;  %v153_v21 = vor.u32 %v152_v14, %v151_v3  ;;  %v155_v23 = vshrl.u32 %v532_v41, %v146_v56  ;;  %v157_v24 = vshll.u32 %v532_v41, %v145_v32 }
  0x28   :  { %v158_v25 = vshrl.u32 %v533_v43, %v146_v56  ;;  %v160_v26 = vshll.u32 %v533_v43, %v145_v32  ;;  %v161_v27 = vshrl.u32 %v534_v51, %v146_v56  ;;  %v82_v28 = vmul.u32 %v563_v31, %v66_v8 }
  0x29   :  { %v156_v29 = vor.u32 %v155_v23, %v154_v22  ;;  %vm163_vm6 = vcmp.lt.s32.totalorder %v567_v45, 1  ;;  %vm164_vm7 = vcmp.lt.s32.totalorder %v567_v45, 2  ;;  %vm84_vm8 = vc.u32 %v577_v17, %v580_v18 }
  0x2a   :  { %v85_v30 = vadd.s32 1, %v581_v19  ;;  %v159_v34 = vor.u32 %v158_v25, %v157_v24  ;;  %vm165_vm9 = vcmp.lt.s32.totalorder %v567_v45, 3  ;;  %v162_v35 = vor.u32 %v161_v27, %v160_v26 }
  0x2b   :  { %vm166_vm10 = vcmp.lt.s32.totalorder %v567_v45, 4  ;;  %v167_v36 = vsel %vm163_vm6, %v147_v6, %v150_v20  ;;  %v171_v32 = vsel %vm163_vm6, %v150_v20, %v153_v21  ;;  %v175_v39 = vsel %vm163_vm6, %v153_v21, %v156_v29 }
  0x2c   :  { %v86_v37 = vsel %vm84_vm8, %v85_v30, %v581_v19  ;;  %v168_v31 = vsel %vm166_vm10, %v156_v29, 2102212464  ;;  %v172_v38 = vsel %vm166_vm10, %v159_v34, 920167782  ;;  %v176_v43 = vsel %vm166_vm10, %v162_v35, 1326507024 }
  0x2d   :  { %v87_v40 = vadd.s32 %v86_v37, %v82_v28  ;;  %v169_v41 = vsel %vm165_vm9, %v153_v21, %v168_v31  ;;  %v173_v42 = vsel %vm165_vm9, %v156_v29, %v172_v38  ;;  %v177_v47 = vsel %vm165_vm9, %v159_v34, %v176_v43 }
  0x2e   :  { %v170_v44 = vsel %vm164_vm7, %v167_v36, %v169_v41  ;;  %v174_v46 = vsel %vm164_vm7, %v171_v32, %v173_v42  ;;  %v178_v49 = vsel %vm164_vm7, %v175_v39, %v177_v47  ;;  %v83_v4 = vadd.s32 %v580_v18, %v577_v17 }
  0x2f   :  { %v88_v48 = vadd.s32 536870912, %v87_v40  ;;  %v598_v50 = vmul.u32.u64.low %v565_v33, %v174_v46  ;;  %v599_v51 = vmul.u32.u64.high %v565_v33, %v174_v46, %v598_v50  ;;  %v186_v55 = vmul.u32 %v565_v33, %v170_v44 }
  0x30   :  { %v602_v52 = vmul.u32.u64.low %v565_v33, %v178_v49  ;;  %v603_v53 = vmul.u32.u64.high %v565_v33, %v178_v49, %v602_v52  ;;  %vm119_vm7 = vweird.f32 %v553_v12 }
  0x31   :  { %v89_v54 = vshrl.u32 %v88_v48, 30  ;;  %v189_v57 = vadd.s32 1, %v599_v51 }
  0x32   :  { %vm188_vm11 = vc.u32 %v603_v53, %v598_v50  ;;  %v187_v24 = vadd.s32 %v598_v50, %v603_v53 }
  0x33   :  { %v90_v56 = vshll.u32 %v89_v54, 30  ;;  %v190_v45 = vsel %vm188_vm11, %v189_v57, %v599_v51  ;;  %v113_v35 = vsub.s32 4, %v89_v54 }
  0x34   :  { %v191_v59 = vadd.s32 %v190_v45, %v186_v55 }
  0x35   :  { %v91_v58 = vsub.s32 %v87_v40, %v90_v56  ;;  %v114_v40 = vsel %vm29_vm14, %v113_v35, %v89_v54 }
  0x36   :  { %v192_v61 = vadd.s32 536870912, %v191_v59  ;;  %v116_v43 = vsel %vm28_vm15, 0, %v114_v40 }
  0x37   :  { %v93_v60 = vsub.s32 0, %v91_v58  ;;  %v120_v47 = vadd.s32 3, %v116_v43  ;;  %v436_v48 = vand.u32 3, %v116_v43 }
  0x38   :  { %v193_v63 = vshrl.u32 %v192_v61, 30 }
  0x39   :  { %v465_v62 = vmin.u32 %v93_v60, %v91_v58  ;;  %v121_v53 = vand.u32 3, %v120_v47  ;;  %vm441_vm2 = vcmp.eq.s32.totalorder %v436_v48, 2  ;;  %vm438_vm3 = vcmp.eq.s32.totalorder %v436_v48, 0 }
  0x3a   :  { %v194_v1 = vshll.u32 %v193_v63, 30  ;;  %v217_v42 = vsub.s32 4, %v193_v63  ;;  %vm437_vm4 = vcmp.lt.s32.totalorder %v436_v48, 2 }
  0x3b   :  { %v95_v0 = vclz %v465_v62  ;;  %vm123_vm5 = vcmp.eq.s32.totalorder %v121_v53, 0  ;;  %vm126_vm6 = vcmp.eq.s32.totalorder %v121_v53, 2  ;;  %vm122_vm8 = vcmp.lt.s32.totalorder %v121_v53, 2 }
  0x3c   :  { %v195_v3 = vsub.s32 %v191_v59, %v194_v1  ;;  %v218_v46 = vsel %vm133_vm0, %v217_v42, %v193_v63 }
  0x3d   :  { %v466_v2 = vadd.s32 4294967294, %v95_v0  ;;  %v220_v51 = vsel %vm132_vm1, 0, %v218_v46 }
  0x3e   :  { %v197_v5 = vsub.s32 0, %v195_v3  ;;  %v329_v56 = vadd.s32 3, %v220_v51  ;;  %v224_v45 = vand.u32 3, %v220_v51 }
  0x3f   :  { %vm467_vm12 = vcmp.lt.s32.totalorder %v466_v2, 0 }
  0x40   :  { %v98_v33 = vsel %vm467_vm12, 0, %v466_v2  ;;  %v469_v9 = vmin.u32 %v197_v5, %v195_v3  ;;  %v330_v59 = vand.u32 3, %v329_v56  ;;  %vm229_vm9 = vcmp.eq.s32.totalorder %v224_v45, 2 }
  0x41   :  { %v99_v6 = vsub.s32 32, %v98_v33  ;;  %v100_v7 = vshll.u32 %v91_v58, %v98_v33  ;;  %v103_v8 = vsub.s32 4294967266, %v98_v33  ;;  %vm226_vm11 = vcmp.eq.s32.totalorder %v224_v45, 0 }
  0x42   :  { %v199_v16 = vclz %v469_v9  ;;  %vm335_vm10 = vcmp.eq.s32.totalorder %v330_v59, 2  ;;  %vm332_vm12 = vcmp.eq.s32.totalorder %v330_v59, 0 }
  0x43   :  { %v101_v10 = vshrl.u32 %v83_v4, %v99_v6  ;;  %v104_v14 = vadd.s32 127, %v103_v8 }
  0x44   :  { %v470_v21 = vadd.s32 4294967294, %v199_v16 }
  0x45   :  { %v102_v19 = vor.u32 %v101_v10, %v100_v7  ;;  %v105_v20 = vshll.u32 %v104_v14, 23 }
  0x46   :  { %vm471_vm13 = vcmp.lt.s32.totalorder %v470_v21, 0 }
  0x47   :  { %v106_v22 = vor.u32 4788187, %v105_v20  ;;  %v109_v23 = vcvt.s32.f32 %v102_v19  ;;  %v202_v17 = vsel %vm471_vm13, 0, %v470_v21  ;;  %vm225_vm13 = vcmp.lt.s32.totalorder %v224_v45, 2 }
  0x48   :  { %v203_v18 = vsub.s32 32, %v202_v17  ;;  %v204_v26 = vshll.u32 %v195_v3, %v202_v17  ;;  %v207_v27 = vsub.s32 4294967266, %v202_v17 }
  0x49   :  { %v107_v25 = vand.u32 2147483647, %v106_v22 }
  0x4a   :  { %v205_v29 = vshrl.u32 %v187_v24, %v203_v18  ;;  %v208_v30 = vadd.s32 127, %v207_v27 }
  0x4b   :  { %v110_v28 = vmul.f32 %v109_v23, %v107_v25 }
  0x4c   :  { %v206_v36 = vor.u32 %v205_v29, %v204_v26  ;;  %v209_v32 = vshll.u32 %v208_v30, 23 }
  0x4d   :  { %v111_v34 = vxor.u32 2147483648, %v110_v28 }
  0x4e   :  { %v210_v38 = vor.u32 4788187, %v209_v32  ;;  %v213_v39 = vcvt.s32.f32 %v206_v36 }
  0x4f   :  { %v112_v37 = vsel %vm29_vm14, %v111_v34, %v110_v28  ;;  %vm331_vm14 = vcmp.lt.s32.totalorder %v330_v59, 2 }
  0x50   :  { %v115_v31 = vsel %vm28_vm15, %v553_v12, %v112_v37  ;;  %v211_v41 = vand.u32 2147483647, %v210_v38  ;;  %vm223_vm15 = vweird.f32 %v551_v11 }
  0x51   :  { %497 = vcosq.f32 %v115_v31 }
  0x52   :  { %499 = vsinq.f32 %v115_v31  ;;  %v214_v44 = vmul.f32 %v213_v39, %v211_v41 }
  0x54   :  { %v215_v13 = vxor.u32 2147483648, %v214_v44 }
  0x56   :  { %v216_v49 = vsel %vm133_vm0, %v215_v13, %v214_v44 }
  0x57   :  { %v219_v50 = vsel %vm132_vm1, %v551_v11, %v216_v49 }
  0x58   :  { %501 = vcosq.f32 %v219_v50 }
  0x59   :  { %503 = vsinq.f32 %v219_v50 }
  0x5b   :  { %v498_v52 = vpop.eup %497 }
  0x5c   :  { %v500_v54 = vpop.eup %499  ;;  %v127_v55 = vxor.u32 2147483648, %v498_v52 }
  0x5d   :  { %v124_v57 = vxor.u32 2147483648, %v500_v54 }
  0x5e   :  { %v443_v15 = vsel %vm441_vm2, %v127_v55, %v500_v54  ;;  %v128_v63 = vsel %vm126_vm6, %v127_v55, %v500_v54 }
  0x5f   :  { %v440_v58 = vsel %vm438_vm3, %v498_v52, %v124_v57  ;;  %v125_v62 = vsel %vm123_vm5, %v498_v52, %v124_v57 }
  0x60   :  { %v444_v60 = vsel %vm437_vm4, %v440_v58, %v443_v15  ;;  %v129_v2 = vsel %vm122_vm8, %v125_v62, %v128_v63 }
  0x61   :  { %v445_v61 = vsel %vm119_vm7, nan, %v444_v60  ;;  %v130_v6 = vsel %vm119_vm7, nan, %v129_v2 }
  0x62   :  { %447 = vst [vmem:[#allocation3 + $0x4] sm:$0x3] %v445_v61  ;;  %v502_v0 = vpop.eup %501 }
  0x63   :  { %v504_v1 = vpop.eup %503  ;;  %v230_v3 = vxor.u32 2147483648, %v502_v0 }
  0x64   :  { %v227_v4 = vxor.u32 2147483648, %v504_v1 }
  0x65   :  { %v231_v33 = vsel %vm229_vm9, %v230_v3, %v504_v1  ;;  %v337_v5 = vsel %vm335_vm10, %v230_v3, %v504_v1 }
  0x66   :  { %v228_v7 = vsel %vm226_vm11, %v502_v0, %v227_v4  ;;  %v334_v8 = vsel %vm332_vm12, %v502_v0, %v227_v4 }
  0x67   :  { %v232_v9 = vsel %vm225_vm13, %v228_v7, %v231_v33  ;;  %v338_v10 = vsel %vm331_vm14, %v334_v8, %v337_v5 }
  0x68   :  { %v233_v14 = vsel %vm223_vm15, nan, %v232_v9  ;;  %v339_v16 = vsel %vm223_vm15, nan, %v338_v10 }
  0x69   :  { %v234_v19 = vmul.f32 %v233_v14, %v130_v6  ;;  %v340_v20 = vmul.f32 %v339_v16, %v130_v6 }
  0x6b   :  { %235 = vst [vmem:[#allocation3] sm:$0x3] %v234_v19  ;;  %342 = vst [vmem:[#allocation3 + $0x2] sm:$0x3] %v340_v20 }
  0x6c   :  { %516 = shalt.err (!%p513_p4)
}
  0x6d   :  { %s517_s12 = scalar_lea.hbm %s638_s1, 96 }
  0x6e   :  { %p518_p5 = scmp.ne.s32.totalorder %s638_s1, %s517_s12  ;;  %p521_p6 = scmp.lt.u32.totalorder %s517_s12, %s638_s1 }
  0x70   :  { %p523_p7 = pnand %p521_p6, %p518_p5 }
  0x72   :  { %526 = shalt.err (!%p523_p7)
}
  0x73   :  { %s536_s17 = smov 32   ;;  %s537_s18 = smov 2  }
  0x74   :  { %459 = dma.vmem_to_hbm [thread:$0]  %s454_s8, 96, %s638_s1, [#allocation4], %s536_s17, %s536_s17, %s537_s18  }
  0x75   :  { %527 = dma.done.wait [#allocation4], 96  }
  0x76   :  { %528 = vsyncadd [#allocation4], 4294967200 }
  0x77   :  { %463 = vsyncpa [#allocation4], 1 }

</bundles_post_ra>
